<compile_context>
chip_gen: v6e
topology: v6e:2x2x1
jax: 0.10.0
libtpu: 0.0.40
codegen_flags: <defaults>
</compile_context>

<pallas_src>
import jax
import jax.numpy as jnp
from jax import lax
from jax.experimental import pallas as pl
from jax.experimental.pallas import tpu as pltpu


_DEFAULT_TB_CAP = 8192  # big enough to amortize ~0.35us/step; fits all gens.


def _round_up(n, m):
    return (n + m - 1) // m * m


def _choose_tb(batch, tb):
    cap = _DEFAULT_TB_CAP if tb is None else max(8, _round_up(int(tb), 8))
    if cap >= batch:
        # Single (possibly ragged) tile; block second-minor only needs %8.
        return _round_up(batch, 8)
    # Multi-tile: output block last dim must be a multiple of 128 (lane-dense).
    return max(128, _round_up(cap, 128))


def _sigmoid(z):
    # sigmoid(z) == 0.5 * tanh(0.5 * z) + 0.5: one EUP op per element instead
    # of exp + divide, so the EUP slot stops binding at large batch tiles.
    return 0.5 * jnp.tanh(0.5 * z) + 0.5


def mlp_kernel(x_ref, w1_ref, b1_ref, w2_ref, b2_ref, o_ref):
    x = x_ref[...]        # (TB, D_in), f32 or bf16 straight from HBM
    w1 = w1_ref[...]      # (H, D_in), PyTorch nn.Linear layout, same dtype as x

    # Layer 1 on the MXU with f32 accumulation, consuming the PyTorch
    # (out_features, in_features) layout directly (no transpose anywhere).
    h = lax.dot_general(x, w1, (((1,), (1,)), ((), ())),
                        preferred_element_type=jnp.float32)
    p = _sigmoid(h + b1_ref[...])                      # (TB, H) in f32

    # Layer 2: (1, H) x (TB, H)^T -> lane-dense (1, TB) row.  Wide last dim
    # means unmasked vector stores and a tiny output VMEM buffer.
    o = lax.dot_general(w2_ref[...], p, (((1,), (1,)), ((), ())),
                        preferred_element_type=jnp.float32)
    o_ref[...] = _sigmoid(o + b2_ref[0, 0]).astype(o_ref.dtype)


def mlp_forward(x, w_hidden, b_hidden, w_output, b_output, *, tb=None):
    """Forward pass equivalent to the PyTorch MLP.

    x:        (B, D_in)  -- f32, or bf16 to halve the streaming HBM traffic
    w_hidden: (H, D_in)   b_hidden: (H,)      (PyTorch nn.Linear layouts)
    w_output: (1, H)      b_output: (1,)
    Returns (B, 1) in x's dtype.
    """
    B, d_in = x.shape
    H = w_hidden.shape[0]

    tb = _choose_tb(B, tb)
    num_tiles = pl.cdiv(B, tb)
    total = num_tiles * tb

    # Tiny parameter tensors: one-off casts, negligible HBM traffic.
    w1 = w_hidden.astype(x.dtype)                        # MXU operands match x
    b1 = b_hidden.reshape(1, H).astype(jnp.float32)      # f32 bias broadcast
    w2 = w_output.reshape(1, H).astype(jnp.float32)      # f32 row vector
    b2 = b_output.reshape(1, 1).astype(jnp.float32)      # scalar -> SMEM

    # VMEM budget: double-buffered lane-padded x tile + f32 intermediates +
    # double-buffered (1, tb) output tile + weights/slack.  Clamp to a range
    # that is valid on v5e/v6e (128 MiB) and v7x (64 MiB physical).
    itemsize = jnp.dtype(x.dtype).itemsize
    est = (2 * tb * 128 * itemsize      # x tiles (minor dim lane-pads to 128)
           + 4 * tb * 128 * 4           # f32 h / sigmoid intermediates
           + 2 * 8 * tb * 4             # (1, tb) out tiles (sublane-padded)
           + (4 << 20))                 # weights, biases, misc slack
    vmem_limit = int(min(max(est, 32 << 20), 48 << 20))

    cost = pl.CostEstimate(
        flops=2 * B * H * (d_in + 1),
        transcendentals=B * (H + 1),
        bytes_accessed=(x.size * itemsize + B * itemsize
                        + w1.size * itemsize + (b1.size + w2.size + 1) * 4),
    )

    out = pl.pallas_call(
        mlp_kernel,
        out_shape=jax.ShapeDtypeStruct((1, total), x.dtype),
        grid=(num_tiles,),
        in_specs=[
            # Streamed, double-buffered activation tile (ragged last tile is
            # fine: garbage rows only produce discarded output columns).
            pl.BlockSpec((tb, d_in), lambda i: (i, 0)),
            # Weights/biases: constant block index -> fetched once, VMEM-resident.
            pl.BlockSpec((H, d_in), lambda i: (0, 0)),
            pl.BlockSpec((1, H), lambda i: (0, 0)),
            pl.BlockSpec((1, H), lambda i: (0, 0)),
            # Scalar output bias in SMEM.
            pl.BlockSpec(memory_space=pltpu.MemorySpace.SMEM),
        ],
        # Lane-dense output row per batch tile.
        out_specs=pl.BlockSpec((1, tb), lambda i: (0, i)),
        compiler_params=pltpu.CompilerParams(
            dimension_semantics=("parallel",),
            vmem_limit_bytes=vmem_limit,
        ),
        cost_estimate=cost,
    )(x, w1, b1, w2, b2)

    return out[0, :B].reshape(B, 1)


def _init_linear(key, in_features, out_features, dtype=jnp.float32):
    # Mimics PyTorch nn.Linear default init (uniform +/- 1/sqrt(fan_in)).
    k_w, k_b = jax.random.split(key)
    bound = 1.0 / jnp.sqrt(jnp.array(in_features, dtype))
    w = jax.random.uniform(k_w, (out_features, in_features), dtype, -bound, bound)
    b = jax.random.uniform(k_b, (out_features,), dtype, -bound, bound)
    return w, b


def _reference(x, w_hidden, b_hidden, w_output, b_output):
    xf = x.astype(jnp.float32)
    h = jax.nn.sigmoid(xf @ w_hidden.T + b_hidden)
    return jax.nn.sigmoid(h @ w_output.T + b_output)


if __name__ == "__main__":
    input_size, hidden_size = 16, 32
    key = jax.random.PRNGKey(0)
    k_x1, k_x2, k_x3, k_h, k_o = jax.random.split(key, 5)

    w_hidden, b_hidden = _init_linear(k_h, input_size, hidden_size)
    w_output, b_output = _init_linear(k_o, hidden_size, 1)

    # Case 1: tiny batch, single exact tile, f32.
    x1 = jax.random.normal(k_x1, (8, input_size), jnp.float32)
    out1 = jax.block_until_ready(
        mlp_forward(x1, w_hidden, b_hidden, w_output, b_output))
    ref1 = _reference(x1, w_hidden, b_hidden, w_output, b_output)
    assert out1.shape == (8, 1)
    assert jnp.allclose(out1, ref1, atol=1e-5), "case 1 mismatch vs reference"

    # Case 2: ragged multi-tile grid (tb=64 -> lane-aligned 128, 2 steps), f32,
    # no wrapper padding pass over x.
    x2 = jax.random.normal(k_x2, (200, input_size), jnp.float32)
    out2 = jax.block_until_ready(
        mlp_forward(x2, w_hidden, b_hidden, w_output, b_output, tb=64))
    ref2 = _reference(x2, w_hidden, b_hidden, w_output, b_output)
    assert out2.shape == (200, 1)
    assert jnp.allclose(out2, ref2, atol=1e-5), "case 2 mismatch vs reference"

    # Case 3: default (large-cap) tile selection, ragged single tile, f32.
    x3 = jax.random.normal(k_x3, (3000, input_size), jnp.float32)
    out3 = jax.block_until_ready(
        mlp_forward(x3, w_hidden, b_hidden, w_output, b_output))
    ref3 = _reference(x3, w_hidden, b_hidden, w_output, b_output)
    assert out3.shape == (3000, 1)
    assert jnp.allclose(out3, ref3, atol=1e-5), "case 3 mismatch vs reference"

    # Case 4: bf16 activations consumed directly at the pallas_call boundary
    # (halves the streamed x read); f32 accumulation + f32 bias/sigmoid.
    x2_bf16 = x2.astype(jnp.bfloat16)
    out4 = jax.block_until_ready(
        mlp_forward(x2_bf16, w_hidden, b_hidden, w_output, b_output, tb=128))
    assert out4.shape == (200, 1)
    assert jnp.allclose(out4.astype(jnp.float32), ref2, atol=5e-2), \
        "case 4 mismatch vs reference"

    print("KERNEL_OK")
</pallas_src>

<mosaic_0001>
module attributes {stable_mosaic.version = 11 : i64} {
  func.func @mlp_kernel(%arg0: i32, %arg1: memref<8x16xf32, #tpu.memory_space<vmem>>, %arg2: memref<32x16xf32, #tpu.memory_space<vmem>>, %arg3: memref<1x32xf32, #tpu.memory_space<vmem>>, %arg4: memref<1x32xf32, #tpu.memory_space<vmem>>, %arg5: memref<1x1xf32, #tpu.memory_space<smem>>, %arg6: memref<1x8xf32, #tpu.memory_space<vmem>>) attributes {dimension_semantics = [#tpu.dimension_semantics<parallel>], iteration_bounds = array<i64: 1>, scalar_prefetch = 0 : i64, scratch_operands = 0 : i64, tpu.core_type = #tpu.core_type<tc>, window_params = [{transform_indices = @transform_0, window_bounds = array<i64: 8, 16>}, {pipeline_mode = #tpu.pipeline_mode<synchronous>, transform_indices = @transform_1, window_bounds = array<i64: 32, 16>}, {pipeline_mode = #tpu.pipeline_mode<synchronous>, transform_indices = @transform_2, window_bounds = array<i64: 1, 32>}, {pipeline_mode = #tpu.pipeline_mode<synchronous>, transform_indices = @transform_3, window_bounds = array<i64: 1, 32>}, {transform_indices = @transform_4, window_bounds = array<i64: 1, 1>}, {transform_indices = @transform_5, window_bounds = array<i64: 1, 8>}]} {
    %c0 = arith.constant 0 : index
    %c0_0 = arith.constant 0 : index
    %0 = vector.load %arg1[%c0, %c0_0] : memref<8x16xf32, #tpu.memory_space<vmem>>, vector<8x16xf32>
    %c0_1 = arith.constant 0 : index
    %c0_2 = arith.constant 0 : index
    %1 = vector.load %arg2[%c0_1, %c0_2] : memref<32x16xf32, #tpu.memory_space<vmem>>, vector<32x16xf32>
    %cst = arith.constant dense<0.000000e+00> : vector<8x32xf32>
    %2 = tpu.matmul %0, %1, %cst {dimension_numbers = #tpu.dot_dimension_numbers<[1], [1], [0], [0], [0, 0, 1, 0], [], []>} : vector<8x16xf32>, vector<32x16xf32>, vector<8x32xf32> -> vector<8x32xf32>
    %c0_3 = arith.constant 0 : index
    %c0_4 = arith.constant 0 : index
    %3 = vector.load %arg3[%c0_3, %c0_4] : memref<1x32xf32, #tpu.memory_space<vmem>>, vector<1x32xf32>
    %4 = vector.broadcast %3 : vector<1x32xf32> to vector<8x32xf32>
    %5 = arith.addf %2, %4 : vector<8x32xf32>
    %cst_5 = arith.constant 5.000000e-01 : f32
    %6 = vector.broadcast %cst_5 : f32 to vector<8x32xf32>
    %7 = arith.mulf %6, %5 : vector<8x32xf32>
    %8 = math.tanh %7 : vector<8x32xf32>
    %cst_6 = arith.constant 5.000000e-01 : f32
    %9 = vector.broadcast %cst_6 : f32 to vector<8x32xf32>
    %10 = arith.mulf %9, %8 : vector<8x32xf32>
    %cst_7 = arith.constant 5.000000e-01 : f32
    %11 = vector.broadcast %cst_7 : f32 to vector<8x32xf32>
    %12 = arith.addf %10, %11 : vector<8x32xf32>
    %c0_8 = arith.constant 0 : index
    %c0_9 = arith.constant 0 : index
    %13 = vector.load %arg4[%c0_8, %c0_9] : memref<1x32xf32, #tpu.memory_space<vmem>>, vector<1x32xf32>
    %cst_10 = arith.constant dense<0.000000e+00> : vector<1x8xf32>
    %14 = tpu.matmul %13, %12, %cst_10 {dimension_numbers = #tpu.dot_dimension_numbers<[1], [1], [0], [0], [0, 0, 1, 0], [], []>} : vector<1x32xf32>, vector<8x32xf32>, vector<1x8xf32> -> vector<1x8xf32>
    %c0_11 = arith.constant 0 : index
    %c0_12 = arith.constant 0 : index
    %15 = memref.load %arg5[%c0_11, %c0_12] : memref<1x1xf32, #tpu.memory_space<smem>>
    %16 = vector.broadcast %15 : f32 to vector<1x8xf32>
    %17 = arith.addf %14, %16 : vector<1x8xf32>
    %cst_13 = arith.constant 5.000000e-01 : f32
    %18 = vector.broadcast %cst_13 : f32 to vector<1x8xf32>
    %19 = arith.mulf %18, %17 : vector<1x8xf32>
    %20 = math.tanh %19 : vector<1x8xf32>
    %cst_14 = arith.constant 5.000000e-01 : f32
    %21 = vector.broadcast %cst_14 : f32 to vector<1x8xf32>
    %22 = arith.mulf %21, %20 : vector<1x8xf32>
    %cst_15 = arith.constant 5.000000e-01 : f32
    %23 = vector.broadcast %cst_15 : f32 to vector<1x8xf32>
    %24 = arith.addf %22, %23 : vector<1x8xf32>
    %c0_16 = arith.constant 0 : index
    %c0_17 = arith.constant 0 : index
    %25 = vector.load %arg6[%c0_16, %c0_17] : memref<1x8xf32, #tpu.memory_space<vmem>>, vector<1x8xf32>
    tpu.vector_store %arg6[%c0_16, %c0_17], %24 {strides = array<i32>} : memref<1x8xf32, #tpu.memory_space<vmem>>, vector<1x8xf32>,
    return
  }
  func.func @transform_0(%arg0: i32) -> (i32, i32) {
    %c0_i32 = arith.constant 0 : i32
    %c0_i32_0 = arith.constant 0 : i32
    return %arg0, %c0_i32 : i32, i32
  }
  func.func @transform_1(%arg0: i32) -> (i32, i32) {
    %c0_i32 = arith.constant 0 : i32
    %c0_i32_0 = arith.constant 0 : i32
    %c0_i32_1 = arith.constant 0 : i32
    return %c0_i32, %c0_i32_0 : i32, i32
  }
  func.func @transform_2(%arg0: i32) -> (i32, i32) {
    %c0_i32 = arith.constant 0 : i32
    %c0_i32_0 = arith.constant 0 : i32
    %c0_i32_1 = arith.constant 0 : i32
    return %c0_i32, %c0_i32_0 : i32, i32
  }
  func.func @transform_3(%arg0: i32) -> (i32, i32) {
    %c0_i32 = arith.constant 0 : i32
    %c0_i32_0 = arith.constant 0 : i32
    %c0_i32_1 = arith.constant 0 : i32
    return %c0_i32, %c0_i32_0 : i32, i32
  }
  func.func @transform_4(%arg0: i32) -> (i32, i32) {
    %c0_i32 = arith.constant 0 : i32
    %c0_i32_0 = arith.constant 0 : i32
    %c0_i32_1 = arith.constant 0 : i32
    return %c0_i32, %c0_i32_0 : i32, i32
  }
  func.func @transform_5(%arg0: i32) -> (i32, i32) {
    %c0_i32 = arith.constant 0 : i32
    %c0_i32_0 = arith.constant 0 : i32
    return %c0_i32, %arg0 : i32, i32
  }
}

</mosaic_0001>

<bundles_post_ra>
// kernel: tpu_custom_call.1
= control target key start
LH: loop header
LB: loop body
LE: loop exit
PB: predicated region body
PF: predicated region fallthrough
CT: control target
= control target key end

     0   :  { %vm34_vm0 = vcmask 130048   ;;  %v284_v1 = vmov 0.0   ;;  %vm285_vm1 = vmmov 0   ;;  %s349_s0 = inlined_call_operand.vmem [shape: f32[8,16], index: 0, kind: input, shape index: {}]   ;;  %s350_s1 = inlined_call_operand.vmem [shape: f32[32,16], index: 1, kind: input, shape index: {}]   ;;  %s351_s2 = inlined_call_operand.vmem [shape: f32[1,32], index: 2, kind: input, shape index: {}]   ;;  %s352_s3 = inlined_call_operand.vmem [shape: f32[1,32], index: 3, kind: input, shape index: {}]   ;;  %s353_s4 = inlined_call_operand.<no memory space> [shape: f32[1,1], index: 4, kind: input, shape index: {}]   ;;  %s354_s5 = inlined_call_operand.hbm [shape: f32[1,8], index: 5, kind: output, shape index: {}]  }
   0x1   :  { %v26_v0 = vld [vmem:[%s350_s1 + $0x18] sm:$0xff]  ;;  %239 = vmatprep.subr.mxu0 %v284_v1  ;;  %247 = vmatprep.mubr.msk.f32.mxu0 %vm285_vm1, %v284_v1 }
   0x2   :  { %240 = vmatpush3.xpose.msk.msra.mxu0 %vm34_vm0, %v26_v0  ;;  %250 = vmatprep.subr.mxu1 %v284_v1 }
   0x3   :  { %11 = vsyncpa [#allocation4], 0  ;;  %241 = vmatprep.subr.mxu0 %v284_v1  ;;  %v25_v2 = vld [vmem:[%s350_s1 + $0x10] sm:$0xff]  ;;  %252 = vmatprep.mubr.msk.f32.mxu1 %vm285_vm1, %v284_v1  ;;  %v24_v3 = vld [vmem:[%s350_s1 + $0x8] sm:$0xff]  ;;  %vm127_vm2 = vcmask 261120   ;;  %v126_v15 = vstv %s353_s4  ;;  %vm208_vm3 = vcmask 57344  }
   0x4   :  { %v23_v4 = vld [vmem:[%s350_s1] sm:$0xff] }
   0x5   :  { %v22_v5 = vld [vmem:[%s349_s0] sm:$0xff] }
   0x6   :  { %242 = vmatpush3.xpose.msk.msra.mxu0 %vm34_vm0, %v25_v2  ;;  %v224_v6 = vld [vmem:[%s351_s2] ss:$0 sm:$0xff]  ;;  %s286_s2 = smov [#allocation3]  }
   0x7   :  { %243 = vmatprep.subr.mxu0 %v284_v1  ;;  %v124_v14 = vld [vmem:[%s352_s3] sm:$0x1]  ;;  %s216_s7 = sshll.u32 %s286_s2, 4  ;;  %s217_s7 = int_to_ptr.vmem [resolvable:$true] %s216_s7 }
   0x8   :  { %s262_s8 = scalar_lea.vmem %s217_s7, 16  ;;  %s266_s3 = scalar_lea.vmem %s217_s7, 32 }
   0x9   :  { %p263_p0 = scmp.ne.s32.totalorder %s217_s7, %s262_s8  ;;  %p267_p1 = scmp.lt.s32.totalorder %s217_s7, %s217_s7 }
   0xa   :  { %244 = vmatpush3.xpose.msk.msra.mxu0 %vm34_vm0, %v24_v3  ;;  %p268_p2 = scmp.lt.s32.totalorder %s266_s3, %s262_s8 }
   0xb   :  { %245 = vmatprep.subr.mxu0 %v284_v1 }
   0xc   :  { %p269_p3 = por %p268_p2, %p267_p1 }
   0xe   :  { %246 = vmatpush3.xpose.msk.msra.mxu0 %vm34_vm0, %v23_v4  ;;  %p270_p4 = pnand %p269_p3, %p263_p0 }
  0x11   :  { %248 = vmatmul.mubr.msk.f32.vlgmr.msra.gmra.mxu0 %vm34_vm0, %v22_v5 }
  0xd1   :  { %v116_v7 = vpop.f32.mrf.mxu0 }
  0xd2   :  { %v117_v8 = vadd.f32 %v224_v6, %v116_v7 }
  0xd3   :  { %v249_v9 = vpop.f32.mrf.mxu0 }
  0xd4   :  { %v120_v10 = vmul.f32 0.5, %v117_v8 }
  0xd6   :  { %258 = vtanh.f32 %v120_v10 }
  0xe3   :  { %v259_v11 = vpop.eup %258 }
  0xe4   :  { %v122_v12 = vmul.f32 0.5, %v259_v11 }
  0xe6   :  { %v123_v13 = vadd.f32 0.5, %v122_v12 }
  0xe8   :  { %251 = vmatpush3.xpose.msk.msra.mxu1 %vm127_vm2, %v123_v13 }
  0xeb   :  { %253 = vmatmul.mubr.msk.f32.vlgmr.msra.gmra.mxu1 %vm127_vm2, %v124_v14 }
 0x1ab   :  { %v200_v16 = vpop.f32.mrf.mxu1 }
 0x1ac   :  { %v201_v17 = vadd.f32 %v200_v16, %v126_v15 }
 0x1ad   :  { %v254_v18 = vpop.f32.mrf.mxu1 }
 0x1ae   :  { %v204_v19 = vmul.f32 0.5, %v201_v17 }
 0x1b0   :  { %260 = vtanh.f32 %v204_v19 }
 0x1bd   :  { %v261_v20 = vpop.eup %260 }
 0x1be   :  { %v206_v21 = vmul.f32 0.5, %v261_v20 }
 0x1c0   :  { %v207_v22 = vadd.f32 0.5, %v206_v21 }
 0x1c2   :  { %209 = vst.msk [vmem:[#allocation3] sm:$0x1] %vm208_vm3, %v207_v22 }
 0x1c3   :  { %273 = shalt.err (!%p270_p4)
}
 0x1c4   :  { %219 = dma.vmem_to_hbm [thread:$0]  %s217_s7, 16, %s354_s5, [#allocation4]  }
 0x1c5   :  { %282 = dma.done.wait [#allocation4], 16  }
 0x1c6   :  { %283 = vsyncadd [#allocation4], 4294967280 }
 0x1c7   :  { %223 = vsyncpa [#allocation4], 1 }

</bundles_post_ra>
